<compile_context>
chip_gen: v7x
topology: tpu7x:2x2x1
jax: 0.10.0
libtpu: 0.0.40
codegen_flags: <defaults>
</compile_context>

<pallas_src>
import functools
import math

import jax
import jax.numpy as jnp
from jax.experimental import pallas as pl
from jax.experimental.pallas import tpu as pltpu


# ---------------------------------------------------------------------------
# Tiling helpers
# ---------------------------------------------------------------------------

def _largest_aligned_divisor(dim, cap, align):
    """Largest multiple of `align` that is <= cap and divides dim, else None."""
    t = (cap // align) * align
    while t >= align:
        if dim % t == 0:
            return t
        t -= align
    return None


# ---------------------------------------------------------------------------
# Linear (x @ W + b) kernel
# ---------------------------------------------------------------------------

def _linear_kernel(x_ref, w_ref, b_ref, o_ref, acc_ref):
    @pl.when(pl.program_id(2) == 0)
    def _():
        acc_ref[...] = jnp.zeros_like(acc_ref)

    acc_ref[...] += jnp.dot(x_ref[...], w_ref[...],
                            preferred_element_type=jnp.float32)

    @pl.when(pl.program_id(2) == pl.num_programs(2) - 1)
    def _():
        o_ref[...] = (acc_ref[...] + b_ref[...].astype(jnp.float32)
                      ).astype(o_ref.dtype)


def linear(x, w, b, *, tm=256, tk=512, tn_cap=1536, tn_fallback=512):
    """y = x @ w + b via a tiled Pallas matmul. x:[M,K], w:[K,N], b:[N]."""
    M, K = x.shape
    Kw, N = w.shape
    assert K == Kw and b.shape == (N,)

    # M tile: partial trailing blocks are fine (garbage rows are dropped on
    # store), so no padding is ever materialized.
    tm_e = M if M <= tm else tm
    # N tile: use the full N when it fits (x streamed from HBM exactly once),
    # otherwise a 128-aligned tile (partial trailing block OK).
    if N <= tn_cap:
        tn_e = N
    else:
        tn_e = _largest_aligned_divisor(N, tn_fallback, 128) or tn_fallback
    # K tile: must divide K exactly (it feeds the accumulator). Prefer a
    # 128-aligned divisor; fall back to the full K.
    if K <= tk:
        tk_e = K
    else:
        tk_e = _largest_aligned_divisor(K, tk, 128) or K

    grid = (pl.cdiv(M, tm_e), pl.cdiv(N, tn_e), K // tk_e)

    return pl.pallas_call(
        _linear_kernel,
        out_shape=jax.ShapeDtypeStruct((M, N), x.dtype),
        grid_spec=pltpu.PrefetchScalarGridSpec(
            num_scalar_prefetch=0,
            grid=grid,
            in_specs=[
                pl.BlockSpec((tm_e, tk_e), lambda i, j, k: (i, k)),
                pl.BlockSpec((tk_e, tn_e), lambda i, j, k: (k, j)),
                pl.BlockSpec((1, tn_e), lambda i, j, k: (0, j)),
            ],
            out_specs=pl.BlockSpec((tm_e, tn_e), lambda i, j, k: (i, j)),
            scratch_shapes=[pltpu.VMEM((tm_e, tn_e), jnp.float32)],
        ),
        compiler_params=pltpu.CompilerParams(
            dimension_semantics=("parallel", "parallel", "arbitrary"),
            vmem_limit_bytes=48 * 1024 * 1024,
        ),
    )(x, w, b.reshape(1, N))


# ---------------------------------------------------------------------------
# Fused attention kernel (QK^T + mask + softmax + PV, all heads per step)
# ---------------------------------------------------------------------------

def _attention_kernel(*refs, num_heads, has_mask):
    if has_mask:
        q_ref, k_ref, v_ref, mask_ref, o_ref = refs
    else:
        q_ref, k_ref, v_ref, o_ref = refs

    d_model = q_ref.shape[-1]
    d_k = d_model // num_heads

    # Shared additive mask, loaded once per grid step (re-used by every head).
    m = mask_ref[...].astype(jnp.float32) if has_mask else None

    ctxs = []
    for h in range(num_heads):                      # static unrolled head loop
        lo, hi = h * d_k, (h + 1) * d_k
        qh = q_ref[:, lo:hi]                        # [tq, d_k] (scale pre-folded)
        kh = k_ref[:, lo:hi]                        # [S,  d_k]
        vh = v_ref[:, lo:hi]                        # [S,  d_k]

        # scores = qh @ kh^T (contract last dims; no explicit transpose).
        s = jax.lax.dot_general(qh, kh, (((1,), (1,)), ((), ())),
                                preferred_element_type=jnp.float32)   # [tq, S]
        if has_mask:
            s = s + m

        # Numerically stable softmax; division is deferred to the [tq, d_k]
        # context and performed with an EUP reciprocal.
        s_max = jnp.max(s, axis=-1, keepdims=True)
        p = jnp.exp(s - s_max)
        denom = jnp.sum(p, axis=-1, keepdims=True)

        # TODO(synk): attention-weight dropout omitted (p=0.0 / inference).
        ctx = jnp.dot(p.astype(vh.dtype), vh,
                      preferred_element_type=jnp.float32)             # [tq, d_k]
        ctx = ctx * pl.reciprocal(jnp.maximum(denom, 1e-30), approx=True)
        ctxs.append(ctx)

    out = ctxs[0] if num_heads == 1 else jnp.concatenate(ctxs, axis=-1)
    o_ref[...] = out.astype(o_ref.dtype)            # single lane-dense store


def _attention(q, k, v, num_heads, mask=None, *, tq=256):
    """q, k, v: [B, S, D] (D = num_heads * d_k, head-major columns).
    Optional additive mask of shape [S, S] shared across batch and heads.
    Returns [B, S, D]."""
    B, S, D = q.shape
    has_mask = mask is not None

    # tq=256 is a multiple of 8, so partial trailing q-blocks (handled via
    # cdiv) are legal; OOB rows only produce dropped output rows.
    tq_e = S if S <= tq else tq
    grid = (B, pl.cdiv(S, tq_e))

    in_specs = [
        pl.BlockSpec((pl.Squeezed(), tq_e, D), lambda b, i: (b, i, 0)),
        pl.BlockSpec((pl.Squeezed(), S, D), lambda b, i: (b, 0, 0)),
        pl.BlockSpec((pl.Squeezed(), S, D), lambda b, i: (b, 0, 0)),
    ]
    args = [q, k, v]
    if has_mask:
        # Single [S, S] mask shared across batch and heads (no broadcast copy).
        in_specs.append(pl.BlockSpec((tq_e, S), lambda b, i: (i, 0)))
        args.append(mask)

    kernel = functools.partial(_attention_kernel, num_heads=num_heads,
                               has_mask=has_mask)

    return pl.pallas_call(
        kernel,
        out_shape=jax.ShapeDtypeStruct((B, S, D), q.dtype),
        grid_spec=pltpu.PrefetchScalarGridSpec(
            num_scalar_prefetch=0,
            grid=grid,
            in_specs=in_specs,
            out_specs=pl.BlockSpec((pl.Squeezed(), tq_e, D),
                                   lambda b, i: (b, i, 0)),
        ),
        compiler_params=pltpu.CompilerParams(
            dimension_semantics=("parallel", "parallel"),
            vmem_limit_bytes=48 * 1024 * 1024,
        ),
    )(*args)


# ---------------------------------------------------------------------------
# Full MultiHeadAttention forward
# ---------------------------------------------------------------------------

def multi_head_attention(query, key, value, params, *, num_heads, mask=None):
    B, S, D = query.shape
    assert D % num_heads == 0
    d_k = D // num_heads

    # Fold PerDimScale into the query projection (zero runtime cost):
    #   (x @ Wq + bq) * scale == x @ (Wq * scale) + (bq * scale)
    r_softplus_0 = 1.442695041
    scale = (r_softplus_0 / math.sqrt(d_k)) * jax.nn.softplus(
        params["per_dim_scale"].astype(jnp.float32))
    scale_d = jnp.tile(scale, num_heads).astype(params["wq"].dtype)   # [D]
    wq = params["wq"] * scale_d[None, :]
    bq = params["bq"] * scale_d

    def proj(x, w, b):
        # [B, S, D] -> [B, S, D]; no head transpose — the attention kernel
        # slices heads on-chip from the head-major columns.
        return linear(x.reshape(B * S, D), w, b).reshape(B, S, D)

    q = proj(query, wq, bq)
    k = proj(key, params["wk"], params["bk"])
    v = proj(value, params["wv"], params["bv"])

    mask2d = None
    if mask is not None:
        m = jnp.asarray(mask, jnp.float32)
        # TODO(synk): per-batch / per-head masks would need a (b,)-aware mask
        # BlockSpec; TimesFM uses a single shared additive mask.
        assert all(d == 1 for d in m.shape[:-2]), \
            "mask must be shared across batch and heads"
        mask2d = m.reshape(m.shape[-2], m.shape[-1])
        assert mask2d.shape == (S, S)

    ctx = _attention(q, k, v, num_heads, mask2d)          # [B, S, D]
    out = linear(ctx.reshape(B * S, D), params["wpost"], params["bpost"])
    return out.reshape(B, S, D)


# ---------------------------------------------------------------------------
# Test
# ---------------------------------------------------------------------------

if __name__ == "__main__":
    batch, seq, d_model, num_heads = 2, 8, 32, 4
    d_k = d_model // num_heads

    key0 = jax.random.PRNGKey(0)
    keys = jax.random.split(key0, 12)

    def init_linear(kw, kb, fan_in, fan_out):
        bound = 1.0 / math.sqrt(fan_in)
        w = jax.random.uniform(kw, (fan_in, fan_out), jnp.float32, -bound, bound)
        b = jax.random.uniform(kb, (fan_out,), jnp.float32, -bound, bound)
        return w, b

    wq, bq = init_linear(keys[0], keys[1], d_model, d_model)
    wk, bk = init_linear(keys[2], keys[3], d_model, d_model)
    wv, bv = init_linear(keys[4], keys[5], d_model, d_model)
    wpost, bpost = init_linear(keys[6], keys[7], d_model, d_model)
    per_dim_scale = 0.1 * jax.random.normal(keys[8], (d_k,), jnp.float32)

    params = dict(wq=wq, bq=bq, wk=wk, bk=bk, wv=wv, bv=bv,
                  wpost=wpost, bpost=bpost, per_dim_scale=per_dim_scale)

    q_in = jax.random.normal(keys[9], (batch, seq, d_model), jnp.float32)
    k_in = jax.random.normal(keys[10], (batch, seq, d_model), jnp.float32)
    v_in = jax.random.normal(keys[11], (batch, seq, d_model), jnp.float32)

    # Additive causal mask (finite large negative), shape [1, 1, S, S].
    causal = jnp.tril(jnp.ones((seq, seq), jnp.float32))
    mask = jnp.where(causal == 1.0, 0.0, -1e9).reshape(1, 1, seq, seq)

    def ref_forward(q_raw, k_raw, v_raw, m):
        Bq, Sq, Dq = q_raw.shape
        def proj(x, w, b):
            y = x.reshape(Bq * Sq, Dq) @ w + b
            return y.reshape(Bq, Sq, num_heads, d_k).transpose(0, 2, 1, 3)
        q = proj(q_raw, wq, bq)
        k = proj(k_raw, wk, bk)
        v = proj(v_raw, wv, bv)
        scale = (1.442695041 / math.sqrt(d_k)) * jax.nn.softplus(per_dim_scale)
        attn = jnp.einsum("bhqd,bhkd->bhqk", q * scale, k)
        if m is not None:
            attn = attn + m
        attn = jax.nn.softmax(attn, axis=-1)
        ctx = jnp.einsum("bhqk,bhkd->bhqd", attn, v)
        out = ctx.transpose(0, 2, 1, 3).reshape(Bq * Sq, Dq) @ wpost + bpost
        return out.reshape(Bq, Sq, Dq)

    for m in (None, mask):
        out = multi_head_attention(q_in, k_in, v_in, params,
                                   num_heads=num_heads, mask=m)
        out = jax.block_until_ready(out)
        ref = ref_forward(q_in, k_in, v_in, m)
        assert out.shape == ref.shape and out.dtype == ref.dtype
        err = float(jnp.max(jnp.abs(out - ref)))
        # Tolerance accounts for MXU default-precision f32 matmuls and the
        # approximate (EUP) reciprocal used for the softmax normalization.
        assert err < 1e-2, f"max abs err {err}"

    print("KERNEL_OK")
</pallas_src>

<mosaic_0001>
module attributes {stable_mosaic.version = 11 : i64} {
  func.func @_linear_kernel(%arg0: i32, %arg1: i32, %arg2: i32, %arg3: memref<16x32xf32, #tpu.memory_space<vmem>>, %arg4: memref<32x32xf32, #tpu.memory_space<vmem>>, %arg5: memref<1x32xf32, #tpu.memory_space<vmem>>, %arg6: memref<16x32xf32, #tpu.memory_space<vmem>>, %arg7: memref<16x32xf32, #tpu.memory_space<vmem>>) attributes {dimension_semantics = [#tpu.dimension_semantics<parallel>, #tpu.dimension_semantics<parallel>, #tpu.dimension_semantics<arbitrary>], iteration_bounds = array<i64: 1, 1, 1>, scalar_prefetch = 0 : i64, scratch_operands = 1 : i64, tpu.core_type = #tpu.core_type<tc>, window_params = [{transform_indices = @transform_0, window_bounds = array<i64: 16, 32>}, {transform_indices = @transform_1, window_bounds = array<i64: 32, 32>}, {transform_indices = @transform_2, window_bounds = array<i64: 1, 32>}, {transform_indices = @transform_3, window_bounds = array<i64: 16, 32>}]} {
    %c0_i32 = arith.constant 0 : i32
    %0 = arith.cmpi eq, %arg2, %c0_i32 : i32
    %1 = arith.extui %0 : i1 to i32
    %c0_i32_0 = arith.constant 0 : i32
    %2 = arith.cmpi ne, %1, %c0_i32_0 : i32
    scf.if %2 {
      %cst_10 = arith.constant 0.000000e+00 : f32
      %12 = vector.broadcast %cst_10 : f32 to vector<16x32xf32>
      %c0_11 = arith.constant 0 : index
      %c0_12 = arith.constant 0 : index
      %13 = vector.load %arg7[%c0_11, %c0_12] : memref<16x32xf32, #tpu.memory_space<vmem>>, vector<16x32xf32>
      tpu.vector_store %arg7[%c0_11, %c0_12], %12 {strides = array<i32>} : memref<16x32xf32, #tpu.memory_space<vmem>>, vector<16x32xf32>,
    } else {
    }
    %c0 = arith.constant 0 : index
    %c0_1 = arith.constant 0 : index
    %3 = vector.load %arg7[%c0, %c0_1] : memref<16x32xf32, #tpu.memory_space<vmem>>, vector<16x32xf32>
    %c0_2 = arith.constant 0 : index
    %c0_3 = arith.constant 0 : index
    %4 = vector.load %arg3[%c0_2, %c0_3] : memref<16x32xf32, #tpu.memory_space<vmem>>, vector<16x32xf32>
    %c0_4 = arith.constant 0 : index
    %c0_5 = arith.constant 0 : index
    %5 = vector.load %arg4[%c0_4, %c0_5] : memref<32x32xf32, #tpu.memory_space<vmem>>, vector<32x32xf32>
    %cst = arith.constant dense<0.000000e+00> : vector<16x32xf32>
    %6 = tpu.matmul %4, %5, %cst {dimension_numbers = #tpu.dot_dimension_numbers<[1], [0], [0], [1], [0, 0, 1, 1], [], []>} : vector<16x32xf32>, vector<32x32xf32>, vector<16x32xf32> -> vector<16x32xf32>
    %7 = arith.addf %3, %6 : vector<16x32xf32>
    %c0_6 = arith.constant 0 : index
    %c0_7 = arith.constant 0 : index
    %8 = vector.load %arg7[%c0_6, %c0_7] : memref<16x32xf32, #tpu.memory_space<vmem>>, vector<16x32xf32>
    tpu.vector_store %arg7[%c0_6, %c0_7], %7 {strides = array<i32>} : memref<16x32xf32, #tpu.memory_space<vmem>>, vector<16x32xf32>,
    %c0_i32_8 = arith.constant 0 : i32
    %9 = arith.cmpi eq, %arg2, %c0_i32_8 : i32
    %10 = arith.extui %9 : i1 to i32
    %c0_i32_9 = arith.constant 0 : i32
    %11 = arith.cmpi ne, %10, %c0_i32_9 : i32
    scf.if %11 {
      %c0_10 = arith.constant 0 : index
      %c0_11 = arith.constant 0 : index
      %12 = vector.load %arg7[%c0_10, %c0_11] : memref<16x32xf32, #tpu.memory_space<vmem>>, vector<16x32xf32>
      %c0_12 = arith.constant 0 : index
      %c0_13 = arith.constant 0 : index
      %13 = vector.load %arg5[%c0_12, %c0_13] : memref<1x32xf32, #tpu.memory_space<vmem>>, vector<1x32xf32>
      %14 = vector.broadcast %13 : vector<1x32xf32> to vector<16x32xf32>
      %15 = arith.addf %12, %14 : vector<16x32xf32>
      %c0_14 = arith.constant 0 : index
      %c0_15 = arith.constant 0 : index
      %16 = vector.load %arg6[%c0_14, %c0_15] : memref<16x32xf32, #tpu.memory_space<vmem>>, vector<16x32xf32>
      tpu.vector_store %arg6[%c0_14, %c0_15], %15 {strides = array<i32>} : memref<16x32xf32, #tpu.memory_space<vmem>>, vector<16x32xf32>,
    } else {
    }
    return
  }
  func.func @transform_0(%arg0: i32, %arg1: i32, %arg2: i32) -> (i32, i32) {
    %c0_i32 = arith.constant 0 : i32
    return %arg0, %arg2 : i32, i32
  }
  func.func @transform_1(%arg0: i32, %arg1: i32, %arg2: i32) -> (i32, i32) {
    %c0_i32 = arith.constant 0 : i32
    return %arg2, %arg1 : i32, i32
  }
  func.func @transform_2(%arg0: i32, %arg1: i32, %arg2: i32) -> (i32, i32) {
    %c0_i32 = arith.constant 0 : i32
    %c0_i32_0 = arith.constant 0 : i32
    return %c0_i32, %arg1 : i32, i32
  }
  func.func @transform_3(%arg0: i32, %arg1: i32, %arg2: i32) -> (i32, i32) {
    %c0_i32 = arith.constant 0 : i32
    return %arg0, %arg1 : i32, i32
  }
}

</mosaic_0001>

<bundles_post_ra>
// kernel: tpu_custom_call.1
= control target key start
LH: loop header
LB: loop body
LE: loop exit
PB: predicated region body
PF: predicated region fallthrough
CT: control target
= control target key end

     0   :  { %8 = vsyncpa [#allocation4], 0  ;;  %s366_s0 = inlined_call_operand.hbm [shape: f32[16,32], index: 0, kind: input, shape index: {}]   ;;  %s367_s1 = inlined_call_operand.hbm [shape: f32[32,32], index: 1, kind: input, shape index: {}]   ;;  %s368_s2 = inlined_call_operand.vmem [shape: f32[1,32], index: 2, kind: input, shape index: {}]   ;;  %s369_s3 = inlined_call_operand.hbm [shape: f32[16,32], index: 3, kind: output, shape index: {}]  }
   0x1   :  { %9 = vsyncpa [#allocation7], 0 }
   0x2   :  { %10 = vsyncpa [#allocation5], 0  ;;  %s284_s12 = smov [#allocation3]   ;;  %s212_s16 = scalar_lea.hbm %s366_s0, 256 }
   0x3   :  { %s16_s13 = sshll.u32 %s284_s12, 4  ;;  %p213_p0 = scmp.ne.s32.totalorder %s366_s0, %s212_s16  ;;  %s17_s13 = int_to_ptr.vmem [resolvable:$true] %s16_s13 }
   0x4   :  { %p216_p1 = scmp.lt.u32.totalorder %s212_s16, %s366_s0 }
   0x6   :  { %p218_p2 = pnand %p216_p1, %p213_p0 }
   0x8   :  { %221 = shalt.err (!%p218_p2)
}
   0x9   :  { %s222_s21 = scalar_lea.vmem %s17_s13, 256  ;;  %p227_p4 = scmp.lt.s32.totalorder %s17_s13, %s17_s13 }
   0xa   :  { %p223_p3 = scmp.ne.s32.totalorder %s17_s13, %s222_s21  ;;  %p228_p5 = scmp.lt.s32.totalorder %s222_s21, %s222_s21 }
   0xc   :  { %p229_p6 = por %p228_p5, %p227_p4 }
   0xe   :  { %p230_p7 = pnand %p229_p6, %p223_p3 }
  0x10   :  { %233 = shalt.err (!%p230_p7)
}
  0x11   :  { %s285_s22 = smov 128   ;;  %s286_s23 = smov 8  }
  0x12   :  { %22 = dma.hbm_to_vmem [thread:$0]  %s366_s0, 256, %s17_s13, [#allocation4], %s285_s22, %s285_s22, %s286_s23  }
  0x13   :  { %s287_s26 = smov [#allocation6]   ;;  %s234_s30 = scalar_lea.hbm %s367_s1, 512 }
  0x14   :  { %s28_s27 = sshll.u32 %s287_s26, 4  ;;  %p235_p8 = scmp.ne.s32.totalorder %s367_s1, %s234_s30  ;;  %s29_s27 = int_to_ptr.vmem [resolvable:$true] %s28_s27 }
  0x15   :  { %p238_p9 = scmp.lt.u32.totalorder %s234_s30, %s367_s1 }
  0x17   :  { %p240_p10 = pnand %p238_p9, %p235_p8 }
  0x19   :  { %243 = shalt.err (!%p240_p10)
}
  0x1a   :  { %s244_s8 = scalar_lea.vmem %s29_s27, 512  ;;  %p249_p12 = scmp.lt.s32.totalorder %s29_s27, %s29_s27 }
  0x1b   :  { %p245_p11 = scmp.ne.s32.totalorder %s29_s27, %s244_s8  ;;  %p250_p13 = scmp.lt.s32.totalorder %s244_s8, %s244_s8 }
  0x1d   :  { %p251_p0 = por %p250_p13, %p249_p12 }
  0x1f   :  { %p252_p1 = pnand %p251_p0, %p245_p11 }
  0x21   :  { %255 = shalt.err (!%p252_p1)
}
  0x22   :  { %34 = dma.hbm_to_vmem [thread:$0]  %s367_s1, 512, %s29_s27, [#allocation7], %s285_s22, %s285_s22, %s286_s23  }
  0x23   :  { %278 = dma.done.wait [#allocation4], 256  }
  0x24   :  { %279 = vsyncadd [#allocation4], 4294967040 }
  0x25   :  { %280 = dma.done.wait [#allocation7], 512  }
  0x26   :  { %281 = vsyncadd [#allocation7], 4294966784  ;;  %vm47_vm0 = vcmask 261120   ;;  %v288_v0 = vmov 0.0   ;;  %v54_v1 = vld [vmem:[#allocation6] sm:$0xff]  ;;  %v55_v2 = vld [vmem:[#allocation6 + $0x8] sm:$0xff] }
  0x27   :  { %49 = vst.msk [vmem:[#allocation2 + $0x8] sm:$0xff] %vm47_vm0, %v288_v0  ;;  %48 = vst.msk [vmem:[#allocation2] sm:$0xff] %vm47_vm0, %v288_v0  ;;  %v56_v3 = vld [vmem:[#allocation6 + $0x10] sm:$0xff]  ;;  %v198_v4 = vpack.c.bf16 %v55_v2, %v54_v1  ;;  %v57_v5 = vld [vmem:[#allocation6 + $0x18] sm:$0xff]  ;;  %s289_s11 = smov [#allocation8]  }
  0x28   :  { %v52_v6 = vld [vmem:[#allocation3] sm:$0xff]  ;;  %v202_v7 = vpack.c.bf16 %v57_v5, %v56_v3  ;;  %v53_v8 = vld [vmem:[#allocation3 + $0x8] sm:$0xff]  ;;  %v180_v15 = vld [vmem:[%s368_s2] ss:$0 sm:$0xff]  ;;  %s165_s12 = sshll.u32 %s289_s11, 4  ;;  %s166_s12 = int_to_ptr.vmem [resolvable:$true] %s165_s12 }
  0x29   :  { %195 = vmatprep.mubr.msk.f32.mxu0 %vm47_vm0, %v52_v6  ;;  %199 = vmatprep.subr.bf16.mxu0 %v198_v4  ;;  %s256_s13 = scalar_lea.vmem %s166_s12, 256  ;;  %p261_p3 = scmp.lt.s32.totalorder %s166_s12, %s166_s12 }
  0x2a   :  { %201 = vmatpush3.bf16.msra.mxu0 %v198_v4  ;;  %p257_p2 = scmp.ne.s32.totalorder %s166_s12, %s256_s13  ;;  %p262_p4 = scmp.lt.s32.totalorder %s256_s13, %s256_s13 }
  0x2b   :  { %203 = vmatprep.subr.bf16.mxu0 %v202_v7 }
  0x2c   :  { %p263_p5 = por %p262_p4, %p261_p3 }
  0x2e   :  { %205 = vmatpush3.bf16.msra.mxu0 %v202_v7  ;;  %v51_v9 = vld [vmem:[#allocation2 + $0x8] sm:$0xff]  ;;  %v50_v10 = vld [vmem:[#allocation2] sm:$0xff]  ;;  %p264_p6 = pnand %p263_p5, %p257_p2 }
  0x31   :  { %196 = vmatmul.mubr.msk.f32.vlgmr.msra.gmra.mrb[0].mxu0 %vm47_vm0, %v53_v8 }
 0x104   :  { %v197_v11 = vpop.f32.mrb[0].mxu0 }
 0x105   :  { %v141_v12 = vadd.f32 %v197_v11, %v51_v9  ;;  %v131_v13 = vpop.f32.mrb[1].mxu0 }
 0x106   :  { %v140_v14 = vadd.f32 %v131_v13, %v50_v10 }
 0x107   :  { %143 = vst.msk [vmem:[#allocation2 + $0x8] sm:$0xff] %vm47_vm0, %v141_v12 }
 0x108   :  { %142 = vst.msk [vmem:[#allocation2] sm:$0xff] %vm47_vm0, %v140_v14 }
 0x10e   :  { %v148_v16 = vld [vmem:[#allocation2 + $0x8] sm:$0xff] }
 0x10f   :  { %v147_v17 = vld [vmem:[#allocation2] sm:$0xff]  ;;  %v157_v18 = vadd.f32 %v180_v15, %v148_v16 }
 0x110   :  { %v156_v19 = vadd.f32 %v180_v15, %v147_v17 }
 0x111   :  { %159 = vst.msk [vmem:[#allocation8 + $0x8] sm:$0xff] %vm47_vm0, %v157_v18 }
 0x112   :  { %158 = vst.msk [vmem:[#allocation8] sm:$0xff] %vm47_vm0, %v156_v19 }
 0x113   :  { %267 = shalt.err (!%p264_p6)
}
 0x114   :  { %s268_s15 = scalar_lea.hbm %s369_s3, 256 }
 0x115   :  { %p269_p7 = scmp.ne.s32.totalorder %s369_s3, %s268_s15  ;;  %p272_p8 = scmp.lt.u32.totalorder %s268_s15, %s369_s3 }
 0x117   :  { %p274_p9 = pnand %p272_p8, %p269_p7 }
 0x119   :  { %277 = shalt.err (!%p274_p9)
}
 0x11a   :  { %171 = dma.vmem_to_hbm [thread:$0]  %s166_s12, 256, %s369_s3, [#allocation5], %s285_s22, %s285_s22, %s286_s23  }
 0x11b   :  { %282 = dma.done.wait [#allocation5], 256  }
 0x11c   :  { %283 = vsyncadd [#allocation5], 4294967040 }
 0x11d   :  { %175 = vsyncpa [#allocation4], 1 }
 0x11e   :  { %176 = vsyncpa [#allocation7], 1 }
 0x11f   :  { %177 = vsyncpa [#allocation5], 1 }

</bundles_post_ra>
